<compile_context>
chip_gen: v5e
topology: v5e:2x2
jax: 0.10.0
libtpu: 0.0.40
codegen_flags: <defaults>
</compile_context>

<pallas_src>
import jax
import jax.numpy as jnp
from jax.experimental import pallas as pl
from jax.experimental.pallas import tpu as pltpu


def _round_up(n: int, m: int) -> int:
    return ((n + m - 1) // m) * m


def _encoder_kernel(x_ref, w1_ref, b1_ref, w2_ref, b2_ref, w3_ref, b3_ref,
                    o_ref):
    """Push one (TM, in_dim) activation tile through the 3-layer MLP."""
    cdt = w1_ref.dtype  # MXU compute dtype (f32 or bf16); accumulation is f32

    # Linear -> ReLU
    h1 = jnp.dot(x_ref[...], w1_ref[...],
                 preferred_element_type=jnp.float32) + b1_ref[...]
    h1 = jnp.maximum(h1, 0.0).astype(cdt)

    # Linear -> ReLU
    h2 = jnp.dot(h1, w2_ref[...],
                 preferred_element_type=jnp.float32) + b2_ref[...]
    h2 = jnp.maximum(h2, 0.0).astype(cdt)

    # Final Linear (no activation). Output columns are zero-padded to a
    # lane-dense width in the wrapper, so this is an unmasked full store.
    out = jnp.dot(h2, w3_ref[...],
                  preferred_element_type=jnp.float32) + b3_ref[...]
    o_ref[...] = out.astype(o_ref.dtype)


def encoder_forward(xi, y, params, *, block_rows=256,
                    compute_dtype=jnp.float32):
    """Pallas implementation of EncoderNetwork.forward."""
    # match torch's unsqueeze(0) for 1-D inputs
    if xi.ndim == 1:
        xi = xi[None, :]
    if y.ndim == 1:
        y = y[None, :]

    w1, b1, w2, b2, w3, b3 = params
    design_dim = xi.shape[-1]
    observation_dim = y.shape[-1]
    expected_dim = w1.shape[0]
    if design_dim + observation_dim != expected_dim:
        raise ValueError(
            f"Input dimensions do not match: got {design_dim + observation_dim},"
            f" expected {expected_dim}")
    # TODO(synk): the PyTorch forward also prints the tensor shapes; host-side
    # logging has no in-kernel equivalent and is omitted.

    B = xi.shape[0]
    in_dim = expected_dim
    enc_dim = w3.shape[-1]

    # ---- wrapper-side layout work (keeps the kernel MXU/VPU-only) ---------
    # Concatenate once: one contiguous DMA instead of two tiny lane tiles.
    x = jnp.concatenate([xi, y], axis=-1)

    # Lane-dense output: pad last Linear to a multiple of 128 output columns.
    enc_pad = _round_up(enc_dim, 128)
    if enc_pad != enc_dim:
        w3 = jnp.pad(w3, ((0, 0), (0, enc_pad - enc_dim)))
        b3 = jnp.pad(b3, ((0, 0), (0, enc_pad - enc_dim)))

    # Batch tiling: TM rows per grid step (multiple of 8); pad rows with 0.
    block_rows = _round_up(max(int(block_rows), 8), 8)
    tm = min(block_rows, _round_up(B, 8))
    bp = _round_up(B, tm)
    if bp != B:
        x = jnp.pad(x, ((0, bp - B), (0, 0)))
    grid = (bp // tm,)

    # Compute dtype: bf16 is the fast MXU path on v6e/v7x (f32 accumulation).
    cdt = jnp.dtype(compute_dtype)
    x = x.astype(cdt)
    w1 = w1.astype(cdt)
    w2 = w2.astype(cdt)
    w3 = w3.astype(cdt)
    b1 = b1.astype(jnp.float32)
    b2 = b2.astype(jnp.float32)
    b3 = b3.astype(jnp.float32)

    # Weights/biases: full-array blocks, constant index_map -> VMEM-resident
    # across the whole grid (total footprint is only tens of KB).
    def resident(a):
        return pl.BlockSpec(a.shape, lambda i: (0,) * a.ndim)

    out_padded = pl.pallas_call(
        _encoder_kernel,
        out_shape=jax.ShapeDtypeStruct((bp, enc_pad), jnp.float32),
        grid=grid,
        in_specs=[
            pl.BlockSpec((tm, in_dim), lambda i: (i, 0)),   # activation tiles
            resident(w1), resident(b1),
            resident(w2), resident(b2),
            resident(w3), resident(b3),
        ],
        out_specs=pl.BlockSpec((tm, enc_pad), lambda i: (i, 0)),
        compiler_params=pltpu.CompilerParams(
            dimension_semantics=("parallel",)),   # v7x: shard across both TCs
    )(x, w1, b1, w2, b2, w3, b3)

    return out_padded[:B, :enc_dim]


def init_params(key, design_dim, observation_dim, hidden_dim, encoding_dim):
    """Deterministic synthetic parameters (shapes from EncoderNetwork.__init__)."""
    in_dim = design_dim + observation_dim
    k1, k2, k3, k4, k5, k6 = jax.random.split(key, 6)
    scale = 0.1
    w1 = scale * jax.random.normal(k1, (in_dim, hidden_dim), jnp.float32)
    b1 = scale * jax.random.normal(k2, (1, hidden_dim), jnp.float32)
    w2 = scale * jax.random.normal(k3, (hidden_dim, hidden_dim), jnp.float32)
    b2 = scale * jax.random.normal(k4, (1, hidden_dim), jnp.float32)
    w3 = scale * jax.random.normal(k5, (hidden_dim, encoding_dim), jnp.float32)
    b3 = scale * jax.random.normal(k6, (1, encoding_dim), jnp.float32)
    return (w1, b1, w2, b2, w3, b3)


def reference_forward(xi, y, params):
    """Plain-JAX reference for correctness checking."""
    if xi.ndim == 1:
        xi = xi[None, :]
    if y.ndim == 1:
        y = y[None, :]
    w1, b1, w2, b2, w3, b3 = params
    x = jnp.concatenate([xi, y], axis=-1)
    h1 = jnp.maximum(x @ w1 + b1, 0.0)
    h2 = jnp.maximum(h1 @ w2 + b2, 0.0)
    return h2 @ w3 + b3


if __name__ == "__main__":
    design_dim = 4
    observation_dim = 4
    hidden_dim = 32
    encoding_dim = 16
    batch = 512          # exercises the batch-gridded path: grid=(2,), TM=256

    key = jax.random.PRNGKey(0)
    kp, kxi, ky = jax.random.split(key, 3)
    params = init_params(kp, design_dim, observation_dim, hidden_dim,
                         encoding_dim)

    xi = jax.random.normal(kxi, (batch, design_dim), jnp.float32)
    y = jax.random.normal(ky, (batch, observation_dim), jnp.float32)

    # 1) f32 compute path, batch-gridded (2 tiles of 256 rows).
    out = jax.block_until_ready(encoder_forward(xi, y, params))
    ref = reference_forward(xi, y, params)
    assert out.shape == (batch, encoding_dim)
    assert jnp.allclose(out, ref, atol=1e-5, rtol=1e-5)

    # 2) 1-D inputs (unsqueeze path) + batch smaller than the row tile.
    out1 = jax.block_until_ready(encoder_forward(xi[0], y[0], params))
    ref1 = reference_forward(xi[0], y[0], params)
    assert out1.shape == (1, encoding_dim)
    assert jnp.allclose(out1, ref1, atol=1e-5, rtol=1e-5)

    # 3) bf16 MXU fast path (v6e/v7x), f32 accumulation; looser tolerance.
    out_bf16 = jax.block_until_ready(
        encoder_forward(xi, y, params, compute_dtype=jnp.bfloat16))
    assert out_bf16.shape == (batch, encoding_dim)
    assert jnp.allclose(out_bf16, ref, atol=5e-2, rtol=5e-2)

    print("KERNEL_OK")
</pallas_src>

<mosaic_0001>
module attributes {stable_mosaic.version = 11 : i64} {
  func.func @_encoder_kernel(%arg0: i32, %arg1: memref<256x8xf32, #tpu.memory_space<vmem>>, %arg2: memref<8x32xf32, #tpu.memory_space<vmem>>, %arg3: memref<1x32xf32, #tpu.memory_space<vmem>>, %arg4: memref<32x32xf32, #tpu.memory_space<vmem>>, %arg5: memref<1x32xf32, #tpu.memory_space<vmem>>, %arg6: memref<32x128xf32, #tpu.memory_space<vmem>>, %arg7: memref<1x128xf32, #tpu.memory_space<vmem>>, %arg8: memref<256x128xf32, #tpu.memory_space<vmem>>) attributes {dimension_semantics = [#tpu.dimension_semantics<parallel>], iteration_bounds = array<i64: 2>, scalar_prefetch = 0 : i64, scratch_operands = 0 : i64, tpu.core_type = #tpu.core_type<tc>, window_params = [{transform_indices = @transform_0, window_bounds = array<i64: 256, 8>}, {pipeline_mode = #tpu.pipeline_mode<synchronous>, transform_indices = @transform_1, window_bounds = array<i64: 8, 32>}, {pipeline_mode = #tpu.pipeline_mode<synchronous>, transform_indices = @transform_2, window_bounds = array<i64: 1, 32>}, {pipeline_mode = #tpu.pipeline_mode<synchronous>, transform_indices = @transform_3, window_bounds = array<i64: 32, 32>}, {pipeline_mode = #tpu.pipeline_mode<synchronous>, transform_indices = @transform_4, window_bounds = array<i64: 1, 32>}, {pipeline_mode = #tpu.pipeline_mode<synchronous>, transform_indices = @transform_5, window_bounds = array<i64: 32, 128>}, {pipeline_mode = #tpu.pipeline_mode<synchronous>, transform_indices = @transform_6, window_bounds = array<i64: 1, 128>}, {transform_indices = @transform_7, window_bounds = array<i64: 256, 128>}]} {
    %c0 = arith.constant 0 : index
    %c0_0 = arith.constant 0 : index
    %0 = vector.load %arg1[%c0, %c0_0] : memref<256x8xf32, #tpu.memory_space<vmem>>, vector<256x8xf32>
    %c0_1 = arith.constant 0 : index
    %c0_2 = arith.constant 0 : index
    %1 = vector.load %arg2[%c0_1, %c0_2] : memref<8x32xf32, #tpu.memory_space<vmem>>, vector<8x32xf32>
    %cst = arith.constant dense<0.000000e+00> : vector<256x32xf32>
    %2 = tpu.matmul %0, %1, %cst {dimension_numbers = #tpu.dot_dimension_numbers<[1], [0], [0], [1], [0, 0, 1, 1], [], []>} : vector<256x8xf32>, vector<8x32xf32>, vector<256x32xf32> -> vector<256x32xf32>
    %c0_3 = arith.constant 0 : index
    %c0_4 = arith.constant 0 : index
    %3 = vector.load %arg3[%c0_3, %c0_4] : memref<1x32xf32, #tpu.memory_space<vmem>>, vector<1x32xf32>
    %4 = vector.broadcast %3 : vector<1x32xf32> to vector<256x32xf32>
    %5 = arith.addf %2, %4 : vector<256x32xf32>
    %cst_5 = arith.constant 0.000000e+00 : f32
    %6 = vector.broadcast %cst_5 : f32 to vector<256x32xf32>
    %7 = arith.maximumf %5, %6 : vector<256x32xf32>
    %c0_6 = arith.constant 0 : index
    %c0_7 = arith.constant 0 : index
    %8 = vector.load %arg4[%c0_6, %c0_7] : memref<32x32xf32, #tpu.memory_space<vmem>>, vector<32x32xf32>
    %cst_8 = arith.constant dense<0.000000e+00> : vector<256x32xf32>
    %9 = tpu.matmul %7, %8, %cst_8 {dimension_numbers = #tpu.dot_dimension_numbers<[1], [0], [0], [1], [0, 0, 1, 1], [], []>} : vector<256x32xf32>, vector<32x32xf32>, vector<256x32xf32> -> vector<256x32xf32>
    %c0_9 = arith.constant 0 : index
    %c0_10 = arith.constant 0 : index
    %10 = vector.load %arg5[%c0_9, %c0_10] : memref<1x32xf32, #tpu.memory_space<vmem>>, vector<1x32xf32>
    %11 = vector.broadcast %10 : vector<1x32xf32> to vector<256x32xf32>
    %12 = arith.addf %9, %11 : vector<256x32xf32>
    %cst_11 = arith.constant 0.000000e+00 : f32
    %13 = vector.broadcast %cst_11 : f32 to vector<256x32xf32>
    %14 = arith.maximumf %12, %13 : vector<256x32xf32>
    %c0_12 = arith.constant 0 : index
    %c0_13 = arith.constant 0 : index
    %15 = vector.load %arg6[%c0_12, %c0_13] : memref<32x128xf32, #tpu.memory_space<vmem>>, vector<32x128xf32>
    %cst_14 = arith.constant dense<0.000000e+00> : vector<256x128xf32>
    %16 = tpu.matmul %14, %15, %cst_14 {dimension_numbers = #tpu.dot_dimension_numbers<[1], [0], [0], [1], [0, 0, 1, 1], [], []>} : vector<256x32xf32>, vector<32x128xf32>, vector<256x128xf32> -> vector<256x128xf32>
    %c0_15 = arith.constant 0 : index
    %c0_16 = arith.constant 0 : index
    %17 = vector.load %arg7[%c0_15, %c0_16] : memref<1x128xf32, #tpu.memory_space<vmem>>, vector<1x128xf32>
    %18 = vector.broadcast %17 : vector<1x128xf32> to vector<256x128xf32>
    %19 = arith.addf %16, %18 : vector<256x128xf32>
    %c0_17 = arith.constant 0 : index
    %c0_18 = arith.constant 0 : index
    %20 = vector.load %arg8[%c0_17, %c0_18] : memref<256x128xf32, #tpu.memory_space<vmem>>, vector<256x128xf32>
    tpu.vector_store %arg8[%c0_17, %c0_18], %19 {strides = array<i32>} : memref<256x128xf32, #tpu.memory_space<vmem>>, vector<256x128xf32>,
    return
  }
  func.func @transform_0(%arg0: i32) -> (i32, i32) {
    %c0_i32 = arith.constant 0 : i32
    %c0_i32_0 = arith.constant 0 : i32
    return %arg0, %c0_i32 : i32, i32
  }
  func.func @transform_1(%arg0: i32) -> (i32, i32) {
    %c0_i32 = arith.constant 0 : i32
    %c0_i32_0 = arith.constant 0 : i32
    %c0_i32_1 = arith.constant 0 : i32
    return %c0_i32, %c0_i32_0 : i32, i32
  }
  func.func @transform_2(%arg0: i32) -> (i32, i32) {
    %c0_i32 = arith.constant 0 : i32
    %c0_i32_0 = arith.constant 0 : i32
    %c0_i32_1 = arith.constant 0 : i32
    return %c0_i32, %c0_i32_0 : i32, i32
  }
  func.func @transform_3(%arg0: i32) -> (i32, i32) {
    %c0_i32 = arith.constant 0 : i32
    %c0_i32_0 = arith.constant 0 : i32
    %c0_i32_1 = arith.constant 0 : i32
    return %c0_i32, %c0_i32_0 : i32, i32
  }
  func.func @transform_4(%arg0: i32) -> (i32, i32) {
    %c0_i32 = arith.constant 0 : i32
    %c0_i32_0 = arith.constant 0 : i32
    %c0_i32_1 = arith.constant 0 : i32
    return %c0_i32, %c0_i32_0 : i32, i32
  }
  func.func @transform_5(%arg0: i32) -> (i32, i32) {
    %c0_i32 = arith.constant 0 : i32
    %c0_i32_0 = arith.constant 0 : i32
    %c0_i32_1 = arith.constant 0 : i32
    return %c0_i32, %c0_i32_0 : i32, i32
  }
  func.func @transform_6(%arg0: i32) -> (i32, i32) {
    %c0_i32 = arith.constant 0 : i32
    %c0_i32_0 = arith.constant 0 : i32
    %c0_i32_1 = arith.constant 0 : i32
    return %c0_i32, %c0_i32_0 : i32, i32
  }
  func.func @transform_7(%arg0: i32) -> (i32, i32) {
    %c0_i32 = arith.constant 0 : i32
    %c0_i32_0 = arith.constant 0 : i32
    return %arg0, %c0_i32 : i32, i32
  }
}

</mosaic_0001>

<bundles_post_ra>
// kernel: tpu_custom_call.1
= control target key start
LH: loop header
LB: loop body
LE: loop exit
PB: predicated region body
PF: predicated region fallthrough
CT: control target
= control target key end

     0   :  { %12 = vsyncpa [#allocation3], 0  ;;  %s1795_s0 = inlined_call_operand.vmem [shape: f32[512,8], index: 0, kind: input, shape index: {}]   ;;  %s1796_s1 = inlined_call_operand.vmem [shape: f32[8,32], index: 1, kind: input, shape index: {}]   ;;  %s1797_s2 = inlined_call_operand.vmem [shape: f32[1,32], index: 2, kind: input, shape index: {}]   ;;  %s1798_s3 = inlined_call_operand.vmem [shape: f32[32,32], index: 3, kind: input, shape index: {}]   ;;  %s1799_s4 = inlined_call_operand.vmem [shape: f32[1,32], index: 4, kind: input, shape index: {}]   ;;  %s1800_s5 = inlined_call_operand.vmem [shape: f32[32,128], index: 5, kind: input, shape index: {}]   ;;  %s1801_s6 = inlined_call_operand.vmem [shape: f32[1,128], index: 6, kind: input, shape index: {}]   ;;  %s1802_s7 = inlined_call_operand.hbm [shape: f32[512,128], index: 7, kind: output, shape index: {}]  }
   0x1   :  { %14 = vsyncpa [#allocation3 + $0x1], 0  ;;  %s1404_s24 = smov 0   ;;  %s1406_s25 = smov 0  }
   0x2   :  { %s1408_s26 = smov 0   ;;  %s1410_s27 = smov 0  }
   0x3 LB: > { %s1425_s28 = sadd.s32 4294967295, %s1360_s27   ;;  %s1136_s29 = sadd.s32 4294967294, %s1360_s27   ;;  %s1360_s27 = sphi %s1410_s27, %s1808_s27   ;;  %s1356_s26 = sphi %s1408_s26, %s1807_s26   ;;  %s1352_s25 = sphi %s1406_s25, %s1806_s25   ;;  %s1348_s24 = sphi %s1404_s24, %s1805_s24  }
   0x4   : > { %s1429_s30 = sadd.s32 1, %s1360_s27   ;;  %s179_s8 = sadd.s32 1, %s1356_s26 }
   0x5   : > { %s176_s9 = ssub.s32 %s1360_s27, %s1429_s30  ;;  %p189_p0 = scmp.ne.s32.totalorder %s1356_s26, %s1352_s25 }
   0x6   : > { %p177_p1 = scmp.eq.s32.totalorder %s176_s9, 0  ;;  %p190_p2 = scmp.eq.s32.totalorder %s1425_s28, 1 }
   0x7   : > { %p195_p3 = scmp.ne.s32.totalorder %s1352_s25, %s1348_s24  ;;  %p196_p4 = scmp.eq.s32.totalorder %s1136_s29, 1 }
   0x8   : > { %s1440_s10 = scalar_select %p177_p1, %s1356_s26, %s179_s8  }
   0x9   : > { %p1442_p5 = por %p190_p2, %p189_p0  ;;  %p1446_p6 = por %p196_p4, %p195_p3 }
   0xa   : > { %p1139_p7 = scmp.ge.s32.totalorder %s1360_s27, 1  ;;  %p241_p8 = scmp.lt.s32.totalorder %s1360_s27, 3 }
   0xc   : > { %p242_p9 = pnand %p1139_p7, %p241_p8 }
   0xd   : > { %s1141_s15 = sshll.u32 (!%p242_p9), %s1425_s28, 5  ;;  %s270_s9 = sand.u32 (!%p242_p9), 1, %s1352_s25  }
   0xe   : > { %245 = sbr.rel (%p242_p9) target bundleno = 675 (0x2a3), region = 48  ;;  %p274_p10 = scmp.lt.s32.totalorder (!%p242_p9), %s1141_s15, 63 }
   0xf   : > { %s1140_s13 = sshll.u32 (!%p242_p9), %s270_s9, 8  ;;  %s1244_s17 = sshll.u32 (!%p242_p9), %s1425_s28, 8 }
  0x10   : > { %s1070_s20 = scalar_lea.hbm (!%p242_p9), %s1802_s7, %s1244_s17  ;;  %s1059_s23 = scalar_lea.sflag (!%p242_p9), [#allocation3], %s270_s9 }
  0x11   : > { %s1073_s22 = sshll.u32 (!%p242_p9), %s1070_s20, 4  ;;  %s1318_s14 = scalar_lea.hbm (!%p242_p9), %s1802_s7, 512  ;;  %s1074_s22 = int_to_ptr.hbm [resolvable:$true] %s1073_s22 }
  0x12   : > { %s1312_s28 = sshra.s32 (!%p242_p9), %s1074_s22, 4  ;;  %s1313_s28 = int_to_ptr.hbm [resolvable:$true] %s1312_s28 }
  0x13   : > { %v312_v0 = vld [vmem:[%s1796_s1] sm:$0xff]  ;;  %s1810_s15 = smov (!%p274_p10, %s1141_s15), 63  ;;  %vm317_vm0 = vcmask 64512   ;;  %v562_v13 = vld [vmem:[%s1798_s3 + $0x18] sm:$0xff]  ;;  %v561_v14 = vld [vmem:[%s1798_s3 + $0x10] sm:$0xff]  ;;  %vm567_vm1 = vcmask 261120   ;;  %p1319_p0 = scmp.lt.s32.totalorder %s1313_s28, %s1802_s7 }
  0x14   : > { %429 = vmatpush.msra.mxu0 %v312_v0  ;;  %1245 = vmatpush.msra.mxu3 %v312_v0  ;;  %s1142_s16 = sshll.u32 %s1810_s15, 3  ;;  %v560_v16 = vld [vmem:[%s1798_s3 + $0x8] sm:$0xff]  ;;  %v559_v17 = vld [vmem:[%s1798_s3] sm:$0xff]  ;;  %s1314_s29 = scalar_lea.hbm %s1313_s28, 256 }
  0x15   : > { %s1459_s19 = scalar_lea.vmem %s1795_s0, %s1142_s16  ;;  %676 = vmatpush.msra.mxu1 %v562_v13  ;;  %v1508_v21 = vld [vmem:[%s1797_s2] ss:$0 sm:$0xff]  ;;  %s1667_s16 = scalar_lea.vmem [#allocation2], %s1140_s13 }
  0x16   : > { %v280_v1 = vld [vmem:[%s1459_s19] sm:$0xff]  ;;  %v281_v2 = vld [vmem:[%s1459_s19 + $0x8] sm:$0xff]  ;;  %v282_v3 = vld [vmem:[%s1459_s19 + $0x10] sm:$0xff]  ;;  %1246 = vmatpush.msrb.mxu3 %v562_v13  ;;  %s1071_s21 = sshll.u32 %s1667_s16, 4  ;;  %p1315_p11 = scmp.ne.s32.totalorder %s1313_s28, %s1314_s29  ;;  %s1072_s21 = int_to_ptr.vmem [resolvable:$true] %s1071_s21 }
  0x17   : > { %1143 = vmatmul.msk.f32.vlgmr.msra.gmra.mxu0 %vm317_vm0, %v280_v1  ;;  %v283_v4 = vld [vmem:[%s1459_s19 + $0x18] sm:$0xff]  ;;  %v284_v5 = vld [vmem:[%s1459_s19 + $0x20] sm:$0xff]  ;;  %v285_v6 = vld [vmem:[%s1459_s19 + $0x28] sm:$0xff]  ;;  %677 = vmatpush.msra.mxu1 %v561_v14  ;;  %p1320_p1 = scmp.lt.s32.totalorder %s1318_s14, %s1314_s29 }
  0x18   : > { %v286_v7 = vld [vmem:[%s1459_s19 + $0x30] sm:$0xff]  ;;  %v287_v8 = vld [vmem:[%s1459_s19 + $0x38] sm:$0xff]  ;;  %v288_v9 = vld [vmem:[%s1459_s19 + $0x40] sm:$0xff]  ;;  %1247 = vmatpush.msrb.mxu3 %v561_v14  ;;  %p1316_p12 = pnand %p1315_p11, %p1442_p5 }
  0x19   : > { %v289_v10 = vld [vmem:[%s1459_s19 + $0x48] sm:$0xff]  ;;  %v290_v11 = vld [vmem:[%s1459_s19 + $0x50] sm:$0xff]  ;;  %v291_v12 = vld [vmem:[%s1459_s19 + $0x58] sm:$0xff]  ;;  %678 = vmatpush.msra.mxu1 %v560_v16  ;;  %p1321_p2 = por %p1320_p1, %p1319_p0 }
  0x1a   : > { %v292_v15 = vld [vmem:[%s1459_s19 + $0x60] sm:$0xff]  ;;  %1248 = vmatpush.msrb.mxu3 %v560_v16  ;;  %v293_v18 = vld [vmem:[%s1459_s19 + $0x68] sm:$0xff]  ;;  %v294_v19 = vld [vmem:[%s1459_s19 + $0x70] sm:$0xff]  ;;  %p1317_p13 = pneg %p1316_p12 }
  0x1b   : > { %679 = vmatpush.msra.mxu1 %v559_v17  ;;  %v295_v20 = vld [vmem:[%s1459_s19 + $0x78] sm:$0xff]  ;;  %v296_v23 = vld [vmem:[%s1459_s19 + $0x80] sm:$0xff]  ;;  %v297_v27 = vld [vmem:[%s1459_s19 + $0x88] sm:$0xff] }
  0x1c   : > { %1249 = vmatpush.msrb.mxu3 %v559_v17  ;;  %v298_v31 = vld [vmem:[%s1459_s19 + $0x90] sm:$0xff]  ;;  %v299_v35 = vld [vmem:[%s1459_s19 + $0x98] sm:$0xff]  ;;  %v300_v39 = vld [vmem:[%s1459_s19 + $0xa0] sm:$0xff]  ;;  %p1322_p3 = pnand %p1321_p2, %p1317_p13 }
  0x1d   : > { %v305_v42 = vld [vmem:[%s1459_s19 + $0xc8] sm:$0xff]  ;;  %v306_v47 = vld [vmem:[%s1459_s19 + $0xd0] sm:$0xff]  ;;  %v307_v52 = vld [vmem:[%s1459_s19 + $0xd8] sm:$0xff] }
  0x1e   : > { %1168 = vmatmul.msk.f32.vlgmr.msra.gmra.mxu3 %vm317_vm0, %v305_v42  ;;  %v301_v44 = vld [vmem:[%s1459_s19 + $0xa8] sm:$0xff]  ;;  %v302_v49 = vld [vmem:[%s1459_s19 + $0xb0] sm:$0xff]  ;;  %v303_v54 = vld [vmem:[%s1459_s19 + $0xb8] sm:$0xff] }
  0x1f   : > { %1144 = vmatmul.msk.f32.gmra.mxu0 %vm317_vm0, %v281_v2  ;;  %v308_v57 = vld [vmem:[%s1459_s19 + $0xe0] sm:$0xff]  ;;  %v309_v62 = vld [vmem:[%s1459_s19 + $0xe8] sm:$0xff]  ;;  %v310_v2 = vld [vmem:[%s1459_s19 + $0xf0] sm:$0xff] }
  0x20   : > { %v304_v59 = vld [vmem:[%s1459_s19 + $0xc0] sm:$0xff]  ;;  %v811_v13 = vld [vmem:[%s1800_s5 + $0x10] sm:$0xff] }
  0x21   : > { %v809_v16 = vld [vmem:[%s1800_s5] sm:$0xff] }
  0x26   : > { %1169 = vmatmul.msk.f32.gmra.mxu3 %vm317_vm0, %v306_v47 }
  0x27   : > { %1145 = vmatmul.msk.f32.gmra.mxu0 %vm317_vm0, %v282_v3 }
  0x2e   : > { %1170 = vmatmul.msk.f32.gmra.mxu3 %vm317_vm0, %v307_v52 }
  0x2f   : > { %1146 = vmatmul.msk.f32.gmra.mxu0 %vm317_vm0, %v283_v4 }
  0x36   : > { %1171 = vmatmul.msk.f32.gmra.mxu3 %vm317_vm0, %v308_v57 }
  0x37   : > { %1147 = vmatmul.msk.f32.gmra.mxu0 %vm317_vm0, %v284_v5 }
  0x3e   : > { %1172 = vmatmul.msk.f32.gmra.mxu3 %vm317_vm0, %v309_v62 }
  0x3f   : > { %1148 = vmatmul.msk.f32.gmra.mxu0 %vm317_vm0, %v285_v6  ;;  %v311_v6 = vld [vmem:[%s1459_s19 + $0xf8] sm:$0xff] }
  0x46   : > { %1173 = vmatmul.msk.f32.gmra.mxu3 %vm317_vm0, %v310_v2 }
  0x47   : > { %1149 = vmatmul.msk.f32.gmra.mxu0 %vm317_vm0, %v286_v7 }
  0x4e   : > { %1174 = vmatmul.msk.f32.gmra.mxu3 %vm317_vm0, %v311_v6 }
  0x4f   : > { %1150 = vmatmul.msk.f32.gmra.mxu0 %vm317_vm0, %v287_v8 }
  0x57   : > { %1151 = vmatmul.msk.f32.gmra.mxu0 %vm317_vm0, %v288_v9 }
  0x5f   : > { %1152 = vmatmul.msk.f32.gmra.mxu0 %vm317_vm0, %v289_v10  ;;  %v812_v10 = vld [vmem:[%s1800_s5 + $0x18] sm:$0xff] }
  0x60   : > { %925 = vmatpush.msra.mxu2 %v812_v10  ;;  %1250 = vmatpush.msra.mxu3 %v812_v10 }
  0x62   : > { %926 = vmatpush.msra.mxu2 %v811_v13  ;;  %1251 = vmatpush.msra.mxu3 %v811_v13 }
  0x67   : > { %1153 = vmatmul.msk.f32.gmra.mxu0 %vm317_vm0, %v290_v11 }
  0x6f   : > { %1154 = vmatmul.msk.f32.gmra.mxu0 %vm317_vm0, %v291_v12 }
  0x77   : > { %1155 = vmatmul.msk.f32.gmra.mxu0 %vm317_vm0, %v292_v15  ;;  %v810_v15 = vld [vmem:[%s1800_s5 + $0x8] sm:$0xff] }
  0x78   : > { %927 = vmatpush.msra.mxu2 %v810_v15  ;;  %1252 = vmatpush.msra.mxu3 %v810_v15 }
  0x7a   : > { %928 = vmatpush.msra.mxu2 %v809_v16  ;;  %1253 = vmatpush.msra.mxu3 %v809_v16 }
  0x7f   : > { %1156 = vmatmul.msk.f32.gmra.mxu0 %vm317_vm0, %v293_v18 }
  0x87   : > { %1157 = vmatmul.msk.f32.gmra.mxu0 %vm317_vm0, %v294_v19 }
  0x8f   : > { %1158 = vmatmul.msk.f32.gmra.mxu0 %vm317_vm0, %v295_v20 }
  0x94   : > { %v431_v22 = vpop.f32.mrf.mxu0 }
  0x95   : > { %v432_v24 = vadd.f32 %v1508_v21, %v431_v22 }
  0x97   : > { %v527_v25 = vmax.f32 %v432_v24, 0.0  ;;  %1159 = vmatmul.msk.f32.gmra.mxu0 %vm317_vm0, %v296_v23 }
  0x99   : > { %1175 = vmatmul.msk.f32.vlgmr.msra.gmra.mxu1 %vm567_vm1, %v527_v25 }
  0x9c   : > { %v434_v26 = vpop.f32.mrf.mxu0 }
  0x9d   : > { %v435_v28 = vadd.f32 %v1508_v21, %v434_v26 }
  0x9f   : > { %v528_v29 = vmax.f32 %v435_v28, 0.0  ;;  %1160 = vmatmul.msk.f32.gmra.mxu0 %vm317_vm0, %v297_v27  ;;  %v1589_v27 = vld [vmem:[%s1799_s4] ss:$0 sm:$0xff] }
  0xa1   : > { %1176 = vmatmul.msk.f32.gmra.mxu1 %vm567_vm1, %v528_v29  ;;  %v506_v6 = vpop.f32.mrf.mxu3 }
  0xa4   : > { %v437_v30 = vpop.f32.mrf.mxu0 }
  0xa5   : > { %v438_v32 = vadd.f32 %v1508_v21, %v437_v30 }
  0xa7   : > { %v529_v33 = vmax.f32 %v438_v32, 0.0  ;;  %1161 = vmatmul.msk.f32.gmra.mxu0 %vm317_vm0, %v298_v31 }
  0xa9   : > { %1177 = vmatmul.msk.f32.gmra.mxu1 %vm567_vm1, %v529_v33 }
  0xac   : > { %v440_v34 = vpop.f32.mrf.mxu0 }
  0xad   : > { %v441_v36 = vadd.f32 %v1508_v21, %v440_v34 }
  0xaf   : > { %v530_v37 = vmax.f32 %v441_v36, 0.0  ;;  %1162 = vmatmul.msk.f32.gmra.mxu0 %vm317_vm0, %v299_v35 }
  0xb1   : > { %1178 = vmatmul.msk.f32.gmra.mxu1 %vm567_vm1, %v530_v37 }
  0xb4   : > { %v443_v38 = vpop.f32.mrf.mxu0 }
  0xb5   : > { %v444_v40 = vadd.f32 %v1508_v21, %v443_v38 }
  0xb7   : > { %v531_v41 = vmax.f32 %v444_v40, 0.0  ;;  %1163 = vmatmul.msk.f32.gmra.mxu0 %vm317_vm0, %v300_v39 }
  0xb9   : > { %1179 = vmatmul.msk.f32.gmra.mxu1 %vm567_vm1, %v531_v41 }
  0xbc   : > { %v446_v43 = vpop.f32.mrf.mxu0 }
  0xbd   : > { %v447_v45 = vadd.f32 %v1508_v21, %v446_v43 }
  0xbf   : > { %v532_v46 = vmax.f32 %v447_v45, 0.0  ;;  %1164 = vmatmul.msk.f32.gmra.mxu0 %vm317_vm0, %v301_v44 }
  0xc1   : > { %1180 = vmatmul.msk.f32.gmra.mxu1 %vm567_vm1, %v532_v46 }
  0xc4   : > { %v449_v48 = vpop.f32.mrf.mxu0 }
  0xc5   : > { %v450_v50 = vadd.f32 %v1508_v21, %v449_v48 }
  0xc7   : > { %v533_v51 = vmax.f32 %v450_v50, 0.0  ;;  %1165 = vmatmul.msk.f32.gmra.mxu0 %vm317_vm0, %v302_v49 }
  0xc9   : > { %1181 = vmatmul.msk.f32.gmra.mxu1 %vm567_vm1, %v533_v51 }
  0xcc   : > { %v452_v53 = vpop.f32.mrf.mxu0 }
  0xcd   : > { %v453_v55 = vadd.f32 %v1508_v21, %v452_v53 }
  0xcf   : > { %v534_v56 = vmax.f32 %v453_v55, 0.0  ;;  %1166 = vmatmul.msk.f32.gmra.mxu0 %vm317_vm0, %v303_v54 }
  0xd1   : > { %1182 = vmatmul.msk.f32.gmra.mxu1 %vm567_vm1, %v534_v56 }
  0xd4   : > { %v455_v58 = vpop.f32.mrf.mxu0 }
  0xd5   : > { %v456_v60 = vadd.f32 %v1508_v21, %v455_v58 }
  0xd7   : > { %v535_v61 = vmax.f32 %v456_v60, 0.0  ;;  %1167 = vmatmul.msk.f32.gmra.mxu0 %vm317_vm0, %v304_v59 }
  0xd9   : > { %1183 = vmatmul.msk.f32.gmra.mxu1 %vm567_vm1, %v535_v61 }
  0xdc   : > { %v458_v63 = vpop.f32.mrf.mxu0 }
  0xdd   : > { %v459_v0 = vadd.f32 %v1508_v21, %v458_v63 }
  0xdf   : > { %v536_v1 = vmax.f32 %v459_v0, 0.0 }
  0xe1   : > { %1184 = vmatmul.msk.f32.gmra.mxu1 %vm567_vm1, %v536_v1 }
  0xe4   : > { %v461_v3 = vpop.f32.mrf.mxu0 }
  0xe5   : > { %v462_v4 = vadd.f32 %v1508_v21, %v461_v3 }
  0xe7   : > { %v537_v5 = vmax.f32 %v462_v4, 0.0 }
  0xe9   : > { %1185 = vmatmul.msk.f32.gmra.mxu1 %vm567_vm1, %v537_v5 }
  0xec   : > { %v464_v7 = vpop.f32.mrf.mxu0 }
  0xed   : > { %v465_v8 = vadd.f32 %v1508_v21, %v464_v7 }
  0xef   : > { %v538_v9 = vmax.f32 %v465_v8, 0.0 }
  0xf1   : > { %1186 = vmatmul.msk.f32.gmra.mxu1 %vm567_vm1, %v538_v9 }
  0xf4   : > { %v467_v11 = vpop.f32.mrf.mxu0 }
  0xf5   : > { %v468_v12 = vadd.f32 %v1508_v21, %v467_v11 }
  0xf7   : > { %v539_v14 = vmax.f32 %v468_v12, 0.0 }
  0xf9   : > { %1187 = vmatmul.msk.f32.gmra.mxu1 %vm567_vm1, %v539_v14  ;;  %v509_v14 = vpop.f32.mrf.mxu3 }
  0xfc   : > { %v470_v17 = vpop.f32.mrf.mxu0 }
  0xfd   : > { %v471_v18 = vadd.f32 %v1508_v21, %v470_v17 }
  0xff   : > { %v540_v19 = vmax.f32 %v471_v18, 0.0 }
 0x101   : > { %1188 = vmatmul.msk.f32.gmra.mxu1 %vm567_vm1, %v540_v19 }
 0x104   : > { %v473_v20 = vpop.f32.mrf.mxu0 }
 0x105   : > { %v474_v22 = vadd.f32 %v1508_v21, %v473_v20  ;;  %v507_v20 = vadd.f32 %v1508_v21, %v506_v6 }
 0x107   : > { %v541_v23 = vmax.f32 %v474_v22, 0.0  ;;  %v552_v22 = vmax.f32 %v507_v20, 0.0 }
 0x109   : > { %1189 = vmatmul.msk.f32.gmra.mxu1 %vm567_vm1, %v541_v23 }
 0x10c   : > { %v476_v24 = vpop.f32.mrf.mxu0 }
 0x10d   : > { %v477_v25 = vadd.f32 %v1508_v21, %v476_v24  ;;  %v512_v24 = vpop.f32.mrf.mxu3 }
 0x10f   : > { %v542_v26 = vmax.f32 %v477_v25, 0.0 }
 0x111   : > { %1190 = vmatmul.msk.f32.gmra.mxu1 %vm567_vm1, %v542_v26 }
 0x114   : > { %v479_v28 = vpop.f32.mrf.mxu0 }
 0x115   : > { %v480_v29 = vadd.f32 %v1508_v21, %v479_v28  ;;  %v510_v28 = vadd.f32 %v1508_v21, %v509_v14 }
 0x116   : > { %v681_v30 = vpop.f32.mrf.mxu1 }
 0x117   : > { %v543_v31 = vmax.f32 %v480_v29, 0.0  ;;  %v682_v32 = vadd.f32 %v1589_v27, %v681_v30  ;;  %v553_v29 = vmax.f32 %v510_v28, 0.0 }
 0x119   : > { %v777_v33 = vmax.f32 %v682_v32, 0.0  ;;  %1191 = vmatmul.msk.f32.gmra.mxu1 %vm567_vm1, %v543_v31  ;;  %v515_v32 = vpop.f32.mrf.mxu3 }
 0x11b   : > { %1207 = vmatmul.msk.f32.vlgmr.msra.gmra.mxu2 %vm567_vm1, %v777_v33 }
 0x11c   : > { %v482_v34 = vpop.f32.mrf.mxu0 }
 0x11d   : > { %v483_v35 = vadd.f32 %v1508_v21, %v482_v34  ;;  %v513_v34 = vadd.f32 %v1508_v21, %v512_v24 }
 0x11e   : > { %v684_v36 = vpop.f32.mrf.mxu1 }
 0x11f   : > { %v544_v37 = vmax.f32 %v483_v35, 0.0  ;;  %v685_v38 = vadd.f32 %v1589_v27, %v684_v36  ;;  %v554_v35 = vmax.f32 %v513_v34, 0.0 }
 0x121   : > { %v778_v39 = vmax.f32 %v685_v38, 0.0  ;;  %1192 = vmatmul.msk.f32.gmra.mxu1 %vm567_vm1, %v544_v37 }
 0x123   : > { %1208 = vmatmul.msk.f32.gmra.mxu2 %vm567_vm1, %v778_v39  ;;  %v516_v39 = vadd.f32 %v1508_v21, %v515_v32 }
 0x124   : > { %v485_v40 = vpop.f32.mrf.mxu0 }
 0x125   : > { %v486_v41 = vadd.f32 %v1508_v21, %v485_v40  ;;  %v518_v40 = vpop.f32.mrf.mxu3 }
 0x126   : > { %v687_v42 = vpop.f32.mrf.mxu1 }
 0x127   : > { %v545_v43 = vmax.f32 %v486_v41, 0.0  ;;  %v688_v44 = vadd.f32 %v1589_v27, %v687_v42  ;;  %v555_v41 = vmax.f32 %v516_v39, 0.0 }
 0x129   : > { %v779_v45 = vmax.f32 %v688_v44, 0.0  ;;  %1193 = vmatmul.msk.f32.gmra.mxu1 %vm567_vm1, %v545_v43 }
 0x12b   : > { %1209 = vmatmul.msk.f32.gmra.mxu2 %vm567_vm1, %v779_v45  ;;  %v519_v45 = vadd.f32 %v1508_v21, %v518_v40 }
 0x12c   : > { %v488_v46 = vpop.f32.mrf.mxu0 }
 0x12d   : > { %v489_v47 = vadd.f32 %v1508_v21, %v488_v46  ;;  %v521_v46 = vpop.f32.mrf.mxu3 }
 0x12e   : > { %v690_v48 = vpop.f32.mrf.mxu1 }
 0x12f   : > { %v546_v49 = vmax.f32 %v489_v47, 0.0  ;;  %v691_v50 = vadd.f32 %v1589_v27, %v690_v48  ;;  %v556_v47 = vmax.f32 %v519_v45, 0.0 }
 0x131   : > { %v780_v51 = vmax.f32 %v691_v50, 0.0  ;;  %1194 = vmatmul.msk.f32.gmra.mxu1 %vm567_vm1, %v546_v49 }
 0x133   : > { %1210 = vmatmul.msk.f32.gmra.mxu2 %vm567_vm1, %v780_v51  ;;  %v522_v51 = vadd.f32 %v1508_v21, %v521_v46 }
 0x134   : > { %v491_v52 = vpop.f32.mrf.mxu0 }
 0x135   : > { %v492_v53 = vadd.f32 %v1508_v21, %v491_v52  ;;  %v557_v52 = vmax.f32 %v522_v51, 0.0 }
 0x136   : > { %v693_v54 = vpop.f32.mrf.mxu1 }
 0x137   : > { %v547_v55 = vmax.f32 %v492_v53, 0.0  ;;  %v694_v56 = vadd.f32 %v1589_v27, %v693_v54  ;;  %v524_v54 = vpop.f32.mrf.mxu3 }
 0x139   : > { %v781_v57 = vmax.f32 %v694_v56, 0.0  ;;  %1195 = vmatmul.msk.f32.gmra.mxu1 %vm567_vm1, %v547_v55 }
 0x13b   : > { %1211 = vmatmul.msk.f32.gmra.mxu2 %vm567_vm1, %v781_v57  ;;  %v525_v57 = vadd.f32 %v1508_v21, %v524_v54 }
 0x13c   : > { %v494_v58 = vpop.f32.mrf.mxu0 }
 0x13d   : > { %v495_v59 = vadd.f32 %v1508_v21, %v494_v58  ;;  %v558_v58 = vmax.f32 %v525_v57, 0.0 }
 0x13e   : > { %v696_v60 = vpop.f32.mrf.mxu1 }
 0x13f   : > { %v548_v61 = vmax.f32 %v495_v59, 0.0  ;;  %v697_v62 = vadd.f32 %v1589_v27, %v696_v60 }
 0x141   : > { %v782_v63 = vmax.f32 %v697_v62, 0.0  ;;  %1196 = vmatmul.msk.f32.gmra.mxu1 %vm567_vm1, %v548_v61 }
 0x143   : > { %1212 = vmatmul.msk.f32.gmra.mxu2 %vm567_vm1, %v782_v63 }
 0x144   : > { %v497_v0 = vpop.f32.mrf.mxu0 }
 0x145   : > { %v498_v1 = vadd.f32 %v1508_v21, %v497_v0 }
 0x146   : > { %v699_v2 = vpop.f32.mrf.mxu1 }
 0x147   : > { %v549_v3 = vmax.f32 %v498_v1, 0.0  ;;  %v700_v4 = vadd.f32 %v1589_v27, %v699_v2 }
 0x149   : > { %v783_v5 = vmax.f32 %v700_v4, 0.0  ;;  %1197 = vmatmul.msk.f32.gmra.mxu1 %vm567_vm1, %v549_v3 }
 0x14b   : > { %1213 = vmatmul.msk.f32.gmra.mxu2 %vm567_vm1, %v783_v5 }
 0x14c   : > { %v500_v7 = vpop.f32.mrf.mxu0 }
 0x14d   : > { %v501_v8 = vadd.f32 %v1508_v21, %v500_v7 }
 0x14e   : > { %v702_v9 = vpop.f32.mrf.mxu1 }
 0x14f   : > { %v550_v10 = vmax.f32 %v501_v8, 0.0  ;;  %v703_v11 = vadd.f32 %v1589_v27, %v702_v9 }
 0x151   : > { %v784_v12 = vmax.f32 %v703_v11, 0.0  ;;  %1198 = vmatmul.msk.f32.gmra.mxu1 %vm567_vm1, %v550_v10 }
 0x153   : > { %1214 = vmatmul.msk.f32.gmra.mxu2 %vm567_vm1, %v784_v12 }
 0x154   : > { %v503_v13 = vpop.f32.mrf.mxu0 }
 0x155   : > { %v504_v15 = vadd.f32 %v1508_v21, %v503_v13  ;;  %v1663_v21 = vld [vmem:[%s1801_s6] ss:$0 sm:$0xff] }
 0x156   : > { %v705_v16 = vpop.f32.mrf.mxu1 }
 0x157   : > { %v551_v17 = vmax.f32 %v504_v15, 0.0  ;;  %v706_v18 = vadd.f32 %v1589_v27, %v705_v16 }
 0x159   : > { %v785_v19 = vmax.f32 %v706_v18, 0.0  ;;  %1199 = vmatmul.msk.f32.vlgmr.msrb.gmra.mxu3 %vm567_vm1, %v551_v17 }
 0x15b   : > { %1215 = vmatmul.msk.f32.gmra.mxu2 %vm567_vm1, %v785_v19 }
 0x15e   : > { %v708_v23 = vpop.f32.mrf.mxu1 }
 0x15f   : > { %v709_v25 = vadd.f32 %v1589_v27, %v708_v23 }
 0x161   : > { %v786_v26 = vmax.f32 %v709_v25, 0.0  ;;  %1200 = vmatmul.msk.f32.gmra.mxu3 %vm567_vm1, %v552_v22 }
 0x163   : > { %1216 = vmatmul.msk.f32.gmra.mxu2 %vm567_vm1, %v786_v26 }
 0x166   : > { %v711_v30 = vpop.f32.mrf.mxu1 }
 0x167   : > { %v712_v31 = vadd.f32 %v1589_v27, %v711_v30 }
 0x169   : > { %v787_v33 = vmax.f32 %v712_v31, 0.0  ;;  %1201 = vmatmul.msk.f32.gmra.mxu3 %vm567_vm1, %v553_v29 }
 0x16b   : > { %1217 = vmatmul.msk.f32.gmra.mxu2 %vm567_vm1, %v787_v33 }
 0x16e   : > { %v714_v36 = vpop.f32.mrf.mxu1 }
 0x16f   : > { %v715_v37 = vadd.f32 %v1589_v27, %v714_v36 }
 0x171   : > { %v788_v38 = vmax.f32 %v715_v37, 0.0  ;;  %1202 = vmatmul.msk.f32.gmra.mxu3 %vm567_vm1, %v554_v35 }
 0x173   : > { %1218 = vmatmul.msk.f32.gmra.mxu2 %vm567_vm1, %v788_v38 }
 0x176   : > { %v717_v42 = vpop.f32.mrf.mxu1 }
 0x177   : > { %v718_v43 = vadd.f32 %v1589_v27, %v717_v42 }
 0x179   : > { %v789_v44 = vmax.f32 %v718_v43, 0.0  ;;  %1203 = vmatmul.msk.f32.gmra.mxu3 %vm567_vm1, %v555_v41 }
 0x17b   : > { %1219 = vmatmul.msk.f32.gmra.mxu2 %vm567_vm1, %v789_v44 }
 0x17e   : > { %v720_v48 = vpop.f32.mrf.mxu1 }
 0x17f   : > { %v721_v49 = vadd.f32 %v1589_v27, %v720_v48 }
 0x181   : > { %v790_v50 = vmax.f32 %v721_v49, 0.0  ;;  %1204 = vmatmul.msk.f32.gmra.mxu3 %vm567_vm1, %v556_v47 }
 0x183   : > { %1220 = vmatmul.msk.f32.gmra.mxu2 %vm567_vm1, %v790_v50 }
 0x186   : > { %v723_v53 = vpop.f32.mrf.mxu1 }
 0x187   : > { %v724_v55 = vadd.f32 %v1589_v27, %v723_v53 }
 0x189   : > { %v791_v56 = vmax.f32 %v724_v55, 0.0  ;;  %1205 = vmatmul.msk.f32.gmra.mxu3 %vm567_vm1, %v557_v52 }
 0x18b   : > { %1221 = vmatmul.msk.f32.gmra.mxu2 %vm567_vm1, %v791_v56 }
 0x18e   : > { %v726_v59 = vpop.f32.mrf.mxu1 }
 0x18f   : > { %v727_v60 = vadd.f32 %v1589_v27, %v726_v59 }
 0x191   : > { %v792_v61 = vmax.f32 %v727_v60, 0.0  ;;  %1206 = vmatmul.msk.f32.gmra.mxu3 %vm567_vm1, %v558_v58 }
 0x193   : > { %1222 = vmatmul.msk.f32.gmra.mxu2 %vm567_vm1, %v792_v61 }
 0x196   : > { %v729_v62 = vpop.f32.mrf.mxu1 }
 0x197   : > { %v730_v63 = vadd.f32 %v1589_v27, %v729_v62 }
 0x199   : > { %v793_v0 = vmax.f32 %v730_v63, 0.0 }
 0x19b   : > { %1223 = vmatmul.msk.f32.gmra.mxu2 %vm567_vm1, %v793_v0 }
 0x19e   : > { %v732_v1 = vpop.f32.mrf.mxu1  ;;  %v930_v2 = vpop.f32.mrf.mxu2 }
 0x19f   : > { %v733_v3 = vadd.f32 %v1589_v27, %v732_v1  ;;  %v931_v4 = vadd.f32 %v1663_v21, %v930_v2 }
 0x1a1   : > { %v794_v5 = vmax.f32 %v733_v3, 0.0  ;;  %1026 = vst [vmem:[%s1667_s16] sm:$0xff] %v931_v4 }
 0x1a3   : > { %1224 = vmatmul.msk.f32.gmra.mxu2 %vm567_vm1, %v794_v5 }
 0x1a6   : > { %v735_v6 = vpop.f32.mrf.mxu1  ;;  %v933_v7 = vpop.f32.mrf.mxu2 }
 0x1a7   : > { %v736_v8 = vadd.f32 %v1589_v27, %v735_v6  ;;  %v934_v9 = vadd.f32 %v1663_v21, %v933_v7 }
 0x1a9   : > { %v795_v10 = vmax.f32 %v736_v8, 0.0  ;;  %1027 = vst [vmem:[%s1667_s16 + $0x8] sm:$0xff] %v934_v9 }
 0x1ab   : > { %1225 = vmatmul.msk.f32.gmra.mxu2 %vm567_vm1, %v795_v10 }
 0x1ae   : > { %v738_v11 = vpop.f32.mrf.mxu1  ;;  %v936_v12 = vpop.f32.mrf.mxu2 }
 0x1af   : > { %v739_v13 = vadd.f32 %v1589_v27, %v738_v11  ;;  %v937_v14 = vadd.f32 %v1663_v21, %v936_v12 }
 0x1b1   : > { %v796_v15 = vmax.f32 %v739_v13, 0.0  ;;  %1028 = vst [vmem:[%s1667_s16 + $0x10] sm:$0xff] %v937_v14 }
 0x1b3   : > { %1226 = vmatmul.msk.f32.gmra.mxu2 %vm567_vm1, %v796_v15 }
 0x1b6   : > { %v741_v16 = vpop.f32.mrf.mxu1  ;;  %v939_v17 = vpop.f32.mrf.mxu2 }
 0x1b7   : > { %v742_v18 = vadd.f32 %v1589_v27, %v741_v16  ;;  %v940_v19 = vadd.f32 %v1663_v21, %v939_v17 }
 0x1b9   : > { %v797_v20 = vmax.f32 %v742_v18, 0.0  ;;  %1029 = vst [vmem:[%s1667_s16 + $0x18] sm:$0xff] %v940_v19 }
 0x1bb   : > { %1227 = vmatmul.msk.f32.gmra.mxu2 %vm567_vm1, %v797_v20 }
 0x1be   : > { %v744_v22 = vpop.f32.mrf.mxu1  ;;  %v942_v23 = vpop.f32.mrf.mxu2 }
 0x1bf   : > { %v745_v24 = vadd.f32 %v1589_v27, %v744_v22  ;;  %v943_v25 = vadd.f32 %v1663_v21, %v942_v23 }
 0x1c1   : > { %v798_v26 = vmax.f32 %v745_v24, 0.0  ;;  %1030 = vst [vmem:[%s1667_s16 + $0x20] sm:$0xff] %v943_v25 }
 0x1c3   : > { %1228 = vmatmul.msk.f32.gmra.mxu2 %vm567_vm1, %v798_v26 }
 0x1c6   : > { %v747_v28 = vpop.f32.mrf.mxu1  ;;  %v945_v29 = vpop.f32.mrf.mxu2 }
 0x1c7   : > { %v748_v30 = vadd.f32 %v1589_v27, %v747_v28  ;;  %v946_v31 = vadd.f32 %v1663_v21, %v945_v29 }
 0x1c9   : > { %v799_v32 = vmax.f32 %v748_v30, 0.0  ;;  %1031 = vst [vmem:[%s1667_s16 + $0x28] sm:$0xff] %v946_v31 }
 0x1cb   : > { %1229 = vmatmul.msk.f32.gmra.mxu2 %vm567_vm1, %v799_v32 }
 0x1ce   : > { %v750_v33 = vpop.f32.mrf.mxu1  ;;  %v948_v34 = vpop.f32.mrf.mxu2 }
 0x1cf   : > { %v751_v35 = vadd.f32 %v1589_v27, %v750_v33  ;;  %v949_v36 = vadd.f32 %v1663_v21, %v948_v34 }
 0x1d1   : > { %v800_v37 = vmax.f32 %v751_v35, 0.0  ;;  %1032 = vst [vmem:[%s1667_s16 + $0x30] sm:$0xff] %v949_v36 }
 0x1d3   : > { %1230 = vmatmul.msk.f32.gmra.mxu2 %vm567_vm1, %v800_v37 }
 0x1d6   : > { %v951_v38 = vpop.f32.mrf.mxu2 }
 0x1d7   : > { %v952_v39 = vadd.f32 %v1663_v21, %v951_v38 }
 0x1d9   : > { %1033 = vst [vmem:[%s1667_s16 + $0x38] sm:$0xff] %v952_v39 }
 0x1dc   : > { %v753_v40 = vpop.f32.mrf.mxu3 }
 0x1dd   : > { %v754_v41 = vadd.f32 %v1589_v27, %v753_v40 }
 0x1de   : > { %v954_v42 = vpop.f32.mrf.mxu2 }
 0x1df   : > { %v801_v43 = vmax.f32 %v754_v41, 0.0  ;;  %v955_v44 = vadd.f32 %v1663_v21, %v954_v42 }
 0x1e1   : > { %1034 = vst [vmem:[%s1667_s16 + $0x40] sm:$0xff] %v955_v44  ;;  %1231 = vmatmul.msk.f32.vlgmr.msra.gmra.mxu3 %vm567_vm1, %v801_v43 }
 0x1e4   : > { %v756_v45 = vpop.f32.mrf.mxu3 }
 0x1e5   : > { %v757_v46 = vadd.f32 %v1589_v27, %v756_v45 }
 0x1e6   : > { %v957_v47 = vpop.f32.mrf.mxu2 }
 0x1e7   : > { %v802_v48 = vmax.f32 %v757_v46, 0.0  ;;  %v958_v49 = vadd.f32 %v1663_v21, %v957_v47 }
 0x1e9   : > { %1035 = vst [vmem:[%s1667_s16 + $0x48] sm:$0xff] %v958_v49  ;;  %1232 = vmatmul.msk.f32.gmra.mxu3 %vm567_vm1, %v802_v48 }
 0x1ec   : > { %v759_v50 = vpop.f32.mrf.mxu3 }
 0x1ed   : > { %v760_v51 = vadd.f32 %v1589_v27, %v759_v50 }
 0x1ee   : > { %v960_v52 = vpop.f32.mrf.mxu2 }
 0x1ef   : > { %v803_v53 = vmax.f32 %v760_v51, 0.0  ;;  %v961_v54 = vadd.f32 %v1663_v21, %v960_v52 }
 0x1f1   : > { %1036 = vst [vmem:[%s1667_s16 + $0x50] sm:$0xff] %v961_v54  ;;  %1233 = vmatmul.msk.f32.gmra.mxu3 %vm567_vm1, %v803_v53 }
 0x1f4   : > { %v762_v55 = vpop.f32.mrf.mxu3 }
 0x1f5   : > { %v763_v56 = vadd.f32 %v1589_v27, %v762_v55 }
 0x1f6   : > { %v963_v57 = vpop.f32.mrf.mxu2 }
 0x1f7   : > { %v804_v58 = vmax.f32 %v763_v56, 0.0  ;;  %v964_v59 = vadd.f32 %v1663_v21, %v963_v57 }
 0x1f9   : > { %1037 = vst [vmem:[%s1667_s16 + $0x58] sm:$0xff] %v964_v59  ;;  %1234 = vmatmul.msk.f32.gmra.mxu3 %vm567_vm1, %v804_v58 }
 0x1fc   : > { %v765_v60 = vpop.f32.mrf.mxu3 }
 0x1fd   : > { %v766_v61 = vadd.f32 %v1589_v27, %v765_v60 }
 0x1fe   : > { %v966_v62 = vpop.f32.mrf.mxu2 }
 0x1ff   : > { %v805_v63 = vmax.f32 %v766_v61, 0.0  ;;  %v967_v0 = vadd.f32 %v1663_v21, %v966_v62 }
 0x201   : > { %1038 = vst [vmem:[%s1667_s16 + $0x60] sm:$0xff] %v967_v0  ;;  %1235 = vmatmul.msk.f32.gmra.mxu3 %vm567_vm1, %v805_v63 }
 0x204   : > { %v768_v1 = vpop.f32.mrf.mxu3 }
 0x205   : > { %v769_v2 = vadd.f32 %v1589_v27, %v768_v1 }
 0x206   : > { %v969_v3 = vpop.f32.mrf.mxu2 }
 0x207   : > { %v806_v4 = vmax.f32 %v769_v2, 0.0  ;;  %v970_v5 = vadd.f32 %v1663_v21, %v969_v3 }
 0x209   : > { %1039 = vst [vmem:[%s1667_s16 + $0x68] sm:$0xff] %v970_v5  ;;  %1236 = vmatmul.msk.f32.gmra.mxu3 %vm567_vm1, %v806_v4 }
 0x20c   : > { %v771_v6 = vpop.f32.mrf.mxu3 }
 0x20d   : > { %v772_v7 = vadd.f32 %v1589_v27, %v771_v6 }
 0x20e   : > { %v972_v8 = vpop.f32.mrf.mxu2 }
 0x20f   : > { %v807_v9 = vmax.f32 %v772_v7, 0.0  ;;  %v973_v10 = vadd.f32 %v1663_v21, %v972_v8 }
 0x211   : > { %1040 = vst [vmem:[%s1667_s16 + $0x70] sm:$0xff] %v973_v10  ;;  %1237 = vmatmul.msk.f32.gmra.mxu3 %vm567_vm1, %v807_v9 }
 0x214   : > { %v774_v11 = vpop.f32.mrf.mxu3 }
 0x215   : > { %v775_v12 = vadd.f32 %v1589_v27, %v774_v11 }
 0x216   : > { %v975_v13 = vpop.f32.mrf.mxu2 }
 0x217   : > { %v808_v14 = vmax.f32 %v775_v12, 0.0  ;;  %v976_v15 = vadd.f32 %v1663_v21, %v975_v13 }
 0x219   : > { %1041 = vst [vmem:[%s1667_s16 + $0x78] sm:$0xff] %v976_v15  ;;  %1238 = vmatmul.msk.f32.gmra.mxu3 %vm567_vm1, %v808_v14 }
 0x21e   : > { %v978_v16 = vpop.f32.mrf.mxu2 }
 0x21f   : > { %v979_v17 = vadd.f32 %v1663_v21, %v978_v16 }
 0x221   : > { %1042 = vst [vmem:[%s1667_s16 + $0x80] sm:$0xff] %v979_v17 }
 0x226   : > { %v981_v18 = vpop.f32.mrf.mxu2 }
 0x227   : > { %v982_v19 = vadd.f32 %v1663_v21, %v981_v18 }
 0x229   : > { %1043 = vst [vmem:[%s1667_s16 + $0x88] sm:$0xff] %v982_v19 }
 0x22e   : > { %v984_v27 = vpop.f32.mrf.mxu2 }
 0x22f   : > { %v985_v20 = vadd.f32 %v1663_v21, %v984_v27 }
 0x231   : > { %1044 = vst [vmem:[%s1667_s16 + $0x90] sm:$0xff] %v985_v20 }
 0x236   : > { %v987_v22 = vpop.f32.mrf.mxu2 }
 0x237   : > { %v988_v23 = vadd.f32 %v1663_v21, %v987_v22 }
 0x239   : > { %1045 = vst [vmem:[%s1667_s16 + $0x98] sm:$0xff] %v988_v23 }
 0x23e   : > { %v990_v24 = vpop.f32.mrf.mxu2 }
 0x23f   : > { %v991_v25 = vadd.f32 %v1663_v21, %v990_v24 }
 0x241   : > { %1046 = vst [vmem:[%s1667_s16 + $0xa0] sm:$0xff] %v991_v25 }
 0x246   : > { %v993_v26 = vpop.f32.mrf.mxu2 }
 0x247   : > { %v994_v28 = vadd.f32 %v1663_v21, %v993_v26 }
 0x249   : > { %1047 = vst [vmem:[%s1667_s16 + $0xa8] sm:$0xff] %v994_v28 }
 0x24e   : > { %v996_v29 = vpop.f32.mrf.mxu2 }
 0x24f   : > { %v997_v30 = vadd.f32 %v1663_v21, %v996_v29 }
 0x251   : > { %1048 = vst [vmem:[%s1667_s16 + $0xb0] sm:$0xff] %v997_v30 }
 0x256   : > { %v999_v31 = vpop.f32.mrf.mxu2 }
 0x257   : > { %v1000_v32 = vadd.f32 %v1663_v21, %v999_v31 }
 0x259   : > { %1049 = vst [vmem:[%s1667_s16 + $0xb8] sm:$0xff] %v1000_v32 }
 0x264   : > { %v1002_v33 = vpop.f32.mrf.mxu3 }
 0x265   : > { %v1003_v34 = vadd.f32 %v1663_v21, %v1002_v33 }
 0x267   : > { %1050 = vst [vmem:[%s1667_s16 + $0xc0] sm:$0xff] %v1003_v34 }
 0x26c   : > { %v1005_v35 = vpop.f32.mrf.mxu3 }
 0x26d   : > { %v1006_v36 = vadd.f32 %v1663_v21, %v1005_v35 }
 0x26f   : > { %1051 = vst [vmem:[%s1667_s16 + $0xc8] sm:$0xff] %v1006_v36 }
 0x274   : > { %v1008_v37 = vpop.f32.mrf.mxu3 }
 0x275   : > { %v1009_v38 = vadd.f32 %v1663_v21, %v1008_v37 }
 0x277   : > { %1052 = vst [vmem:[%s1667_s16 + $0xd0] sm:$0xff] %v1009_v38 }
 0x27c   : > { %v1011_v39 = vpop.f32.mrf.mxu3 }
 0x27d   : > { %v1012_v40 = vadd.f32 %v1663_v21, %v1011_v39 }
 0x27f   : > { %1053 = vst [vmem:[%s1667_s16 + $0xd8] sm:$0xff] %v1012_v40 }
 0x284   : > { %v1014_v41 = vpop.f32.mrf.mxu3 }
 0x285   : > { %v1015_v42 = vadd.f32 %v1663_v21, %v1014_v41 }
 0x287   : > { %1054 = vst [vmem:[%s1667_s16 + $0xe0] sm:$0xff] %v1015_v42 }
 0x28c   : > { %v1017_v43 = vpop.f32.mrf.mxu3 }
 0x28d   : > { %v1018_v44 = vadd.f32 %v1663_v21, %v1017_v43 }
 0x28f   : > { %1055 = vst [vmem:[%s1667_s16 + $0xe8] sm:$0xff] %v1018_v44 }
 0x294   : > { %v1020_v45 = vpop.f32.mrf.mxu3 }
 0x295   : > { %v1021_v46 = vadd.f32 %v1663_v21, %v1020_v45 }
 0x297   : > { %1056 = vst [vmem:[%s1667_s16 + $0xf0] sm:$0xff] %v1021_v46 }
 0x29c   : > { %v1023_v47 = vpop.f32.mrf.mxu3 }
 0x29d   : > { %v1024_v48 = vadd.f32 %v1663_v21, %v1023_v47 }
 0x29f   : > { %1057 = vst [vmem:[%s1667_s16 + $0xf8] sm:$0xff] %v1024_v48 }
 0x2a0   : > { %1325 = shalt.err (!%p1322_p3)
}
 0x2a1   : > { %s1362_s9 = smov 128   ;;  %s1363_s16 = smov 8  }
 0x2a2   : > { %1254 = dma.vmem_to_hbm [thread:$0]  (%p1442_p5), %s1072_s21, 4096, %s1074_s22, %s1059_s23, %s1362_s9, %s1362_s9, %s1363_s16  }
 0x2a3 PF: > { %p1260_p4 = scmp.ge.s32.totalorder %s1360_s27, 2  ;;  %s1088_s18 = sand.u32 1, %s1348_s24  }
 0x2a4   : > { %s1089_s19 = scalar_lea.sflag [#allocation3], %s1088_s18 }
 0x2a5   : > { %p1257_p7 = pnand %p1260_p4, %p1446_p6 }
 0x2a7   : > { %p1258_p8 = pneg %p1257_p7 }
 0x2a9   : > { %1343 = dma.done.wait (%p1258_p8), %s1089_s19, 4096  }
 0x2aa   : > { %1345 = vsyncadd (%p1258_p8), %s1089_s19, 4294963200  ;;  %p17_p9 = scmp.ge.s32.totalorder %s1429_s30, 4   ;;  %s1805_s24 = smov %s1352_s25 }
 0x2ab   : > { %s1806_s25 = smov %s1356_s26  ;;  %s1807_s26 = smov %s1440_s10 }
 0x2ac   : > { %s1808_s27 = smov %s1429_s30  ;;  %19 = sbr.rel (!%p17_p9) target bundleno = 3 (0x3), region = 83 }
 0x2b1   :  { %1095 = vsyncpa [#allocation3], 1 }
 0x2b2   :  { %1097 = vsyncpa [#allocation3 + $0x1], 1 }

</bundles_post_ra>
